<compile_context>
chip_gen: v5e
topology: v5e:2x2
jax: 0.10.0
libtpu: 0.0.40
codegen_flags: <defaults>
</compile_context>

<pallas_src>
import functools
import math

import jax
import jax.numpy as jnp
from jax import lax
from jax.experimental import pallas as pl
from jax.experimental.pallas import tpu as pltpu

LANE = 128                 # TPU lane width; all feature/hidden axes padded to this
FEAT = 100                 # fixed by the module: Linear(100, dim) ... Linear(dim, 100)
STATE_DTYPE = jnp.bfloat16  # lane-padded ODE state dtype (I/O); math stays f32 in-kernel


def _cdiv(a, b):
    return (a + b - 1) // b


def _round_up(n, m):
    return _cdiv(n, m) * m


def _choose_tile(B, block_b):
    """Balanced batch tile.

    Avoids padding B up to a distant multiple of a fixed block_b (e.g. 600 -> 1024),
    and splits a single large tile in two so both v7x TensorCores get work
    (harmless on single-TC v5e/v6e)."""
    n_tiles = max(1, _cdiv(B, block_b))
    tb = _round_up(_cdiv(B, n_tiles), 8)
    if n_tiles == 1 and tb >= 16:
        tb = _round_up(_cdiv(B, 2), 8)
    return tb, _round_up(B, tb)


def _compiler_params():
    return pltpu.CompilerParams(
        dimension_semantics=("parallel",),   # megacore sharding over batch tiles (v7x)
        vmem_limit_bytes=32 << 20,           # safe on all gens incl. v7x (64 MiB phys)
    )


# ------------------------------------------------------------------ state packing

def pack_state(x, *, block_b=1024):
    """Pad (B, 100) state ONCE to a lane-dense (Bp, 128) bf16 slab.

    Keep the state in this layout for the whole integration; slice back with
    unpack_state at the very end.  Returns (xp, tb)."""
    B, F = x.shape
    assert F == FEAT, f"expected {FEAT} input features, got {F}"
    tb, Bp = _choose_tile(B, block_b)
    xp = jnp.pad(x.astype(STATE_DTYPE), ((0, Bp - B), (0, LANE - F)))
    return xp, tb


def unpack_state(xp, B, dtype=jnp.float32):
    return xp[:B, :FEAT].astype(dtype)


# ------------------------------------------------------------------ kernels

def odefunc_deep_kernel(x_ref, w1_ref, b1_ref, w2_ref, b2_ref, o_ref):
    # Two MXU matmuls (bf16 inputs, f32 accumulation) + EUP tanh on lane-dense tiles.
    x = x_ref[...].astype(jnp.bfloat16)
    h = jnp.dot(x, w1_ref[...], preferred_element_type=jnp.float32) + b1_ref[...]
    h = jnp.tanh(h)
    y = jnp.dot(h.astype(jnp.bfloat16), w2_ref[...],
                preferred_element_type=jnp.float32) + b2_ref[...]
    o_ref[...] = y.astype(o_ref.dtype)


def _fused_euler_kernel(n_steps, dt,
                        x_ref, w1_ref, b1_ref, w2_ref, b2_ref, o_ref, state_ref):
    """n_steps explicit-Euler steps fused into one kernel invocation.

    State lives in an f32 VMEM scratch across the loop; weights are VMEM-resident
    for the whole grid.  Only the eval input is rounded to bf16 (MXU input)."""
    state_ref[...] = x_ref[...].astype(jnp.float32)

    def step(_, carry):
        xb = state_ref[...].astype(jnp.bfloat16)
        h = jnp.dot(xb, w1_ref[...], preferred_element_type=jnp.float32) + b1_ref[...]
        h = jnp.tanh(h)
        y = jnp.dot(h.astype(jnp.bfloat16), w2_ref[...],
                    preferred_element_type=jnp.float32) + b2_ref[...]
        state_ref[...] = state_ref[...] + dt * y
        return carry

    lax.fori_loop(0, n_steps, step, 0)
    o_ref[...] = state_ref[...].astype(o_ref.dtype)


# ------------------------------------------------------------------ wrappers

def _common_specs(tb, Dp):
    in_specs = [
        pl.BlockSpec((tb, LANE), lambda i: (i, 0)),   # state tile (pipelined over batch)
        pl.BlockSpec((LANE, Dp), lambda i: (0, 0)),   # w1 (VMEM-resident across grid)
        pl.BlockSpec((1, Dp), lambda i: (0, 0)),      # b1
        pl.BlockSpec((Dp, LANE), lambda i: (0, 0)),   # w2
        pl.BlockSpec((1, LANE), lambda i: (0, 0)),    # b2
    ]
    out_spec = pl.BlockSpec((tb, LANE), lambda i: (i, 0))
    return in_specs, out_spec


def odefunc_deep_padded(t, xp, params, *, tb):
    """Single f-eval on lane-padded (Bp, 128) state; returns (Bp, 128)."""
    del t
    w1, b1, w2, b2 = params
    Bp, L = xp.shape
    assert L == LANE and Bp % tb == 0
    Dp = w1.shape[1]
    in_specs, out_spec = _common_specs(tb, Dp)
    return pl.pallas_call(
        odefunc_deep_kernel,
        out_shape=jax.ShapeDtypeStruct((Bp, LANE), xp.dtype),
        grid=(Bp // tb,),
        in_specs=in_specs,
        out_specs=out_spec,
        compiler_params=_compiler_params(),
    )(xp, w1, b1, w2, b2)


def odefunc_deep(t, x, params, *, block_b=1024):
    """Module-forward semantics: (B, 100) -> (B, 100).  `t` is ignored.

    Convenience wrapper (pads/slices once); inside an ODE solver loop prefer the
    padded path (pack_state -> odefunc_deep_padded -> unpack_state) or the fused
    integrator below."""
    xp, tb = pack_state(x, block_b=block_b)
    yp = odefunc_deep_padded(t, xp, params, tb=tb)
    return unpack_state(yp, x.shape[0], x.dtype)


def odeint_euler_fused(x, params, *, dt, n_steps, block_b=1024):
    """n_steps fixed-step Euler integration of dx/dt = f(t, x) in ONE pallas_call.

    Weights + state tile stay VMEM-resident across the in-kernel step loop,
    amortizing dispatch / grid overhead / state HBM traffic over n_steps f-evals."""
    w1, b1, w2, b2 = params
    B = x.shape[0]
    xp, tb = pack_state(x, block_b=block_b)
    Bp = xp.shape[0]
    Dp = w1.shape[1]
    in_specs, out_spec = _common_specs(tb, Dp)
    yp = pl.pallas_call(
        functools.partial(_fused_euler_kernel, n_steps, float(dt)),
        out_shape=jax.ShapeDtypeStruct((Bp, LANE), xp.dtype),
        grid=(Bp // tb,),
        in_specs=in_specs,
        out_specs=out_spec,
        scratch_shapes=[pltpu.VMEM((tb, LANE), jnp.float32)],  # resident f32 state tile
        compiler_params=_compiler_params(),
    )(xp, w1, b1, w2, b2)
    return unpack_state(yp, B, x.dtype)


# ------------------------------------------------------------------ params

def init_params_f32(key, dim=100):
    """Unpadded f32 params matching nn.Linear defaults + xavier_uniform_(gain=sqrt(2)).

    Weights stored pre-transposed as (in_features, out_features) so kernels compute
    plain x @ W + b."""
    k1, k2, k3, k4 = jax.random.split(key, 4)
    gain = math.sqrt(2.0)

    bound1 = gain * math.sqrt(6.0 / (FEAT + dim))
    w1 = jax.random.uniform(k1, (FEAT, dim), jnp.float32, -bound1, bound1)
    bb1 = 1.0 / math.sqrt(FEAT)
    b1 = jax.random.uniform(k2, (1, dim), jnp.float32, -bb1, bb1)

    bound2 = gain * math.sqrt(6.0 / (dim + FEAT))
    w2 = jax.random.uniform(k3, (dim, FEAT), jnp.float32, -bound2, bound2)
    bb2 = 1.0 / math.sqrt(dim)
    b2 = jax.random.uniform(k4, (1, FEAT), jnp.float32, -bb2, bb2)
    return w1, b1, w2, b2


def pack_params(w1, b1, w2, b2, weight_dtype=jnp.bfloat16):
    """Zero-pad feature/hidden axes to lane width 128 and cast weights for the MXU.

    Zero weight rows/cols and zero bias pad entries keep padded lanes at exactly 0
    through both layers (and through the Euler update), so padding never leaks into
    the logical 100 output columns.
    TODO(synk): on v7x, if weights are ever quantized, use fp8 (with scaling) — the
    v7x MXU has no int8/int4 path, so an int8 scheme is not drop-in from v5e/v6e."""
    dim = w1.shape[1]
    Dp = _round_up(dim, LANE)
    w1p = jnp.pad(w1, ((0, LANE - FEAT), (0, Dp - dim))).astype(weight_dtype)
    b1p = jnp.pad(b1, ((0, 0), (0, Dp - dim))).astype(jnp.float32)
    w2p = jnp.pad(w2, ((0, Dp - dim), (0, LANE - FEAT))).astype(weight_dtype)
    b2p = jnp.pad(b2, ((0, 0), (0, LANE - FEAT))).astype(jnp.float32)
    return w1p, b1p, w2p, b2p


# ------------------------------------------------------------------ demo / test

if __name__ == "__main__":
    key = jax.random.PRNGKey(0)
    kp, kx = jax.random.split(key)

    dim = 32      # hidden width of the MLP (module default is 100)
    batch = 8

    w1, b1, w2, b2 = init_params_f32(kp, dim=dim)
    params = pack_params(w1, b1, w2, b2)

    x = jax.random.normal(kx, (batch, FEAT), jnp.float32)
    t = jnp.float32(0.0)  # unused, mirrors the ODE solver signature

    # ---- single f-eval (the module forward) ----
    y = odefunc_deep(t, x, params)
    jax.block_until_ready(y)
    assert y.shape == (batch, FEAT)

    # Pure-JAX reference with the same bf16 roundings the kernel applies.
    w1q = params[0][:FEAT, :dim].astype(jnp.float32)
    w2q = params[2][:dim, :FEAT].astype(jnp.float32)

    def ref_f(v):
        vb = v.astype(jnp.bfloat16).astype(jnp.float32)
        h = jnp.tanh(jnp.dot(vb, w1q, precision=jax.lax.Precision.HIGHEST) + b1)
        hb = h.astype(jnp.bfloat16).astype(jnp.float32)
        return jnp.dot(hb, w2q, precision=jax.lax.Precision.HIGHEST) + b2

    y_ref = ref_f(x)
    err1 = float(jnp.max(jnp.abs(y - y_ref)))
    assert jnp.allclose(y, y_ref, atol=3e-2, rtol=3e-2), f"forward max abs err {err1}"

    # ---- fused multi-eval integrator (the TODO: many f-evals per pallas_call) ----
    n_steps, dt = 4, 0.1
    yf = odeint_euler_fused(x, params, dt=dt, n_steps=n_steps)
    jax.block_until_ready(yf)
    assert yf.shape == (batch, FEAT)

    xr = x
    for _ in range(n_steps):
        xr = xr + dt * ref_f(xr)
    err2 = float(jnp.max(jnp.abs(yf - xr)))
    assert jnp.allclose(yf, xr, atol=3e-2, rtol=3e-2), f"fused max abs err {err2}"

    print("KERNEL_OK")
</pallas_src>

<mosaic_0001>
module attributes {stable_mosaic.version = 11 : i64} {
  func.func @odefunc_deep_kernel(%arg0: i32, %arg1: memref<8x128xbf16, #tpu.memory_space<vmem>>, %arg2: memref<128x128xbf16, #tpu.memory_space<vmem>>, %arg3: memref<1x128xf32, #tpu.memory_space<vmem>>, %arg4: memref<128x128xbf16, #tpu.memory_space<vmem>>, %arg5: memref<1x128xf32, #tpu.memory_space<vmem>>, %arg6: memref<8x128xbf16, #tpu.memory_space<vmem>>) attributes {dimension_semantics = [#tpu.dimension_semantics<parallel>], iteration_bounds = array<i64: 1>, scalar_prefetch = 0 : i64, scratch_operands = 0 : i64, tpu.core_type = #tpu.core_type<tc>, window_params = [{transform_indices = @transform_0, window_bounds = array<i64: 8, 128>}, {pipeline_mode = #tpu.pipeline_mode<synchronous>, transform_indices = @transform_1, window_bounds = array<i64: 128, 128>}, {pipeline_mode = #tpu.pipeline_mode<synchronous>, transform_indices = @transform_2, window_bounds = array<i64: 1, 128>}, {pipeline_mode = #tpu.pipeline_mode<synchronous>, transform_indices = @transform_3, window_bounds = array<i64: 128, 128>}, {pipeline_mode = #tpu.pipeline_mode<synchronous>, transform_indices = @transform_4, window_bounds = array<i64: 1, 128>}, {transform_indices = @transform_5, window_bounds = array<i64: 8, 128>}]} {
    %c0 = arith.constant 0 : index
    %c0_0 = arith.constant 0 : index
    %0 = vector.load %arg1[%c0, %c0_0] : memref<8x128xbf16, #tpu.memory_space<vmem>>, vector<8x128xbf16>
    %c0_1 = arith.constant 0 : index
    %c0_2 = arith.constant 0 : index
    %1 = vector.load %arg2[%c0_1, %c0_2] : memref<128x128xbf16, #tpu.memory_space<vmem>>, vector<128x128xbf16>
    %cst = arith.constant dense<0.000000e+00> : vector<8x128xf32>
    %2 = tpu.matmul %0, %1, %cst {dimension_numbers = #tpu.dot_dimension_numbers<[1], [0], [0], [1], [0, 0, 1, 1], [], []>} : vector<8x128xbf16>, vector<128x128xbf16>, vector<8x128xf32> -> vector<8x128xf32>
    %c0_3 = arith.constant 0 : index
    %c0_4 = arith.constant 0 : index
    %3 = vector.load %arg3[%c0_3, %c0_4] : memref<1x128xf32, #tpu.memory_space<vmem>>, vector<1x128xf32>
    %4 = vector.broadcast %3 : vector<1x128xf32> to vector<8x128xf32>
    %5 = arith.addf %2, %4 : vector<8x128xf32>
    %6 = math.tanh %5 : vector<8x128xf32>
    %7 = arith.truncf %6 : vector<8x128xf32> to vector<8x128xbf16>
    %c0_5 = arith.constant 0 : index
    %c0_6 = arith.constant 0 : index
    %8 = vector.load %arg4[%c0_5, %c0_6] : memref<128x128xbf16, #tpu.memory_space<vmem>>, vector<128x128xbf16>
    %cst_7 = arith.constant dense<0.000000e+00> : vector<8x128xf32>
    %9 = tpu.matmul %7, %8, %cst_7 {dimension_numbers = #tpu.dot_dimension_numbers<[1], [0], [0], [1], [0, 0, 1, 1], [], []>} : vector<8x128xbf16>, vector<128x128xbf16>, vector<8x128xf32> -> vector<8x128xf32>
    %c0_8 = arith.constant 0 : index
    %c0_9 = arith.constant 0 : index
    %10 = vector.load %arg5[%c0_8, %c0_9] : memref<1x128xf32, #tpu.memory_space<vmem>>, vector<1x128xf32>
    %11 = vector.broadcast %10 : vector<1x128xf32> to vector<8x128xf32>
    %12 = arith.addf %9, %11 : vector<8x128xf32>
    %13 = arith.truncf %12 : vector<8x128xf32> to vector<8x128xbf16>
    %c0_10 = arith.constant 0 : index
    %c0_11 = arith.constant 0 : index
    %14 = vector.load %arg6[%c0_10, %c0_11] : memref<8x128xbf16, #tpu.memory_space<vmem>>, vector<8x128xbf16>
    tpu.vector_store %arg6[%c0_10, %c0_11], %13 {strides = array<i32>} : memref<8x128xbf16, #tpu.memory_space<vmem>>, vector<8x128xbf16>,
    return
  }
  func.func @transform_0(%arg0: i32) -> (i32, i32) {
    %c0_i32 = arith.constant 0 : i32
    %c0_i32_0 = arith.constant 0 : i32
    return %arg0, %c0_i32 : i32, i32
  }
  func.func @transform_1(%arg0: i32) -> (i32, i32) {
    %c0_i32 = arith.constant 0 : i32
    %c0_i32_0 = arith.constant 0 : i32
    %c0_i32_1 = arith.constant 0 : i32
    return %c0_i32, %c0_i32_0 : i32, i32
  }
  func.func @transform_2(%arg0: i32) -> (i32, i32) {
    %c0_i32 = arith.constant 0 : i32
    %c0_i32_0 = arith.constant 0 : i32
    %c0_i32_1 = arith.constant 0 : i32
    return %c0_i32, %c0_i32_0 : i32, i32
  }
  func.func @transform_3(%arg0: i32) -> (i32, i32) {
    %c0_i32 = arith.constant 0 : i32
    %c0_i32_0 = arith.constant 0 : i32
    %c0_i32_1 = arith.constant 0 : i32
    return %c0_i32, %c0_i32_0 : i32, i32
  }
  func.func @transform_4(%arg0: i32) -> (i32, i32) {
    %c0_i32 = arith.constant 0 : i32
    %c0_i32_0 = arith.constant 0 : i32
    %c0_i32_1 = arith.constant 0 : i32
    return %c0_i32, %c0_i32_0 : i32, i32
  }
  func.func @transform_5(%arg0: i32) -> (i32, i32) {
    %c0_i32 = arith.constant 0 : i32
    %c0_i32_0 = arith.constant 0 : i32
    return %arg0, %c0_i32 : i32, i32
  }
}

</mosaic_0001>

<bundles_post_ra>
// kernel: tpu_custom_call.1
= control target key start
LH: loop header
LB: loop body
LE: loop exit
PB: predicated region body
PF: predicated region fallthrough
CT: control target
= control target key end

     0   :  { %10 = vsyncpa [#allocation3], 0  ;;  %s497_s0 = inlined_call_operand.hbm [shape: bf16[8,128], index: 0, kind: input, shape index: {}]   ;;  %s498_s1 = inlined_call_operand.hbm [shape: bf16[128,128], index: 1, kind: input, shape index: {}]   ;;  %s499_s2 = inlined_call_operand.vmem [shape: f32[1,128], index: 2, kind: input, shape index: {}]   ;;  %s500_s3 = inlined_call_operand.hbm [shape: bf16[128,128], index: 3, kind: input, shape index: {}]   ;;  %s501_s4 = inlined_call_operand.vmem [shape: f32[1,128], index: 4, kind: input, shape index: {}]   ;;  %s502_s5 = inlined_call_operand.hbm [shape: bf16[8,128], index: 5, kind: output, shape index: {}]  }
   0x1   :  { %11 = vsyncpa [#allocation6], 0  ;;  %s28_s20 = sshll.u32 %s498_s1, 4  ;;  %s29_s20 = int_to_ptr.hbm [resolvable:$true] %s28_s20 }
   0x2   :  { %12 = vsyncpa [#allocation4], 0  ;;  %s443_s21 = smov [#allocation5]   ;;  %s18_s25 = sshll.u32 %s497_s0, 4  ;;  %s19_s25 = int_to_ptr.hbm [resolvable:$true] %s18_s25 }
   0x3   :  { %s30_s22 = sshll.u32 %s443_s21, 4  ;;  %s444_s26 = smov 64   ;;  %s31_s22 = int_to_ptr.vmem [resolvable:$true] %s30_s22 }
   0x4   :  { %s445_s27 = smov 4   ;;  %s446_s28 = smov [#allocation2]  }
   0x5   :  { %36 = dma.hbm_to_vmem [thread:$0]  %s29_s20, 1024, %s31_s22, [#allocation6], %s444_s26, %s444_s26, %s445_s27  }
   0x6   :  { %s20_s29 = sshll.u32 %s446_s28, 4  ;;  %s43_s7 = sshll.u32 %s500_s3, 4  ;;  %s21_s29 = int_to_ptr.vmem [resolvable:$true] %s20_s29  ;;  %s44_s7 = int_to_ptr.hbm [resolvable:$true] %s43_s7 }
   0x7   :  { %23 = dma.hbm_to_vmem [thread:$0]  %s19_s25, 64, %s21_s29, [#allocation3]  }
   0x8   :  { %s447_s1 = smov [#allocation7]  }
   0x9   :  { %s45_s8 = sshll.u32 %s447_s1, 4  ;;  %s46_s8 = int_to_ptr.vmem [resolvable:$true] %s45_s8 }
   0xa   :  { %51 = dma.hbm_to_vmem [thread:$0]  %s44_s7, 1024, %s46_s8, [#allocation6], %s444_s26, %s444_s26, %s445_s27  }
   0xb   :  { %437 = dma.done.wait [#allocation3], 64  }
   0xc   :  { %438 = vsyncadd [#allocation3], 4294967232 }
   0xd   :  { %439 = dma.done.wait [#allocation6], 2048  }
   0xe   :  { %440 = vsyncadd [#allocation6], 4294965248  ;;  %v322_v0 = vld [vmem:[#allocation5 + $0x38] sm:$0xff]  ;;  %v321_v1 = vld [vmem:[#allocation5 + $0x30] sm:$0xff]  ;;  %s448_s11 = smov [#allocation8]   ;;  %s240_s15 = sshll.u32 %s502_s5, 4  ;;  %s241_s15 = int_to_ptr.hbm [resolvable:$true] %s240_s15 }
   0xf   :  { %135 = vmatpush.bf16.msra.mxu0 %v322_v0  ;;  %v330_v2 = vld [vmem:[#allocation7 + $0x38] sm:$0xff]  ;;  %v329_v3 = vld [vmem:[#allocation7 + $0x30] sm:$0xff]  ;;  %v320_v4 = vld [vmem:[#allocation5 + $0x28] sm:$0xff]  ;;  %s238_s12 = sshll.u32 %s448_s11, 4  ;;  %s239_s12 = int_to_ptr.vmem [resolvable:$true] %s238_s12 }
  0x10   :  { %218 = vmatpush.bf16.msra.mxu1 %v330_v2  ;;  %v328_v5 = vld [vmem:[#allocation7 + $0x28] sm:$0xff]  ;;  %v319_v6 = vld [vmem:[#allocation5 + $0x20] sm:$0xff]  ;;  %v318_v8 = vld [vmem:[#allocation5 + $0x18] sm:$0xff] }
  0x11   :  { %v327_v7 = vld [vmem:[#allocation7 + $0x20] sm:$0xff]  ;;  %v326_v9 = vld [vmem:[#allocation7 + $0x18] sm:$0xff]  ;;  %v317_v10 = vld [vmem:[#allocation5 + $0x10] sm:$0xff] }
  0x12   :  { %v316_v11 = vld [vmem:[#allocation5 + $0x8] sm:$0xff]  ;;  %v315_v12 = vld [vmem:[#allocation5] sm:$0xff]  ;;  %v66_v13 = vld [vmem:[#allocation2] sm:$0xf] }
  0x13   :  { %136 = vmatpush.bf16.msra.mxu0 %v321_v1  ;;  %v325_v14 = vld [vmem:[#allocation7 + $0x10] sm:$0xff]  ;;  %v324_v15 = vld [vmem:[#allocation7 + $0x8] sm:$0xff]  ;;  %v323_v16 = vld [vmem:[#allocation7] sm:$0xff] }
  0x14   :  { %219 = vmatpush.bf16.msra.mxu1 %v329_v3  ;;  %v337_v17 = vld [vmem:[%s499_s2] ss:$0 sm:$0xff] }
  0x15   :  { %v338_v23 = vld [vmem:[%s501_s4] ss:$0 sm:$0xff] }
  0x17   :  { %137 = vmatpush.bf16.msra.mxu0 %v320_v4 }
  0x18   :  { %220 = vmatpush.bf16.msra.mxu1 %v328_v5 }
  0x1b   :  { %138 = vmatpush.bf16.msra.mxu0 %v319_v6 }
  0x1c   :  { %221 = vmatpush.bf16.msra.mxu1 %v327_v7 }
  0x1f   :  { %139 = vmatpush.bf16.msra.mxu0 %v318_v8 }
  0x20   :  { %222 = vmatpush.bf16.msra.mxu1 %v326_v9 }
  0x23   :  { %140 = vmatpush.bf16.msra.mxu0 %v317_v10 }
  0x24   :  { %223 = vmatpush.bf16.msra.mxu1 %v325_v14 }
  0x27   :  { %141 = vmatpush.bf16.msra.mxu0 %v316_v11 }
  0x28   :  { %224 = vmatpush.bf16.msra.mxu1 %v324_v15 }
  0x2b   :  { %142 = vmatpush.bf16.msra.mxu0 %v315_v12 }
  0x2c   :  { %225 = vmatpush.bf16.msra.mxu1 %v323_v16 }
  0x2e   :  { %143 = vmatmul.bf16.vlgmr.msra.gmra.mxu0 %v66_v13 }
  0xab   :  { %v144_v18 = vpop.f32.mrf.mxu0 }
  0xac   :  { %v145_v19 = vadd.f32 %v337_v17, %v144_v18 }
  0xae   :  { %339 = vtanh.f32 %v145_v19 }
  0xb3   :  { %v146_v20 = vpop.f32.mrf.mxu0 }
  0xb4   :  { %v340_v21 = vpop.eup %339 }
  0xb5   :  { %v149_v22 = vpack.c.bf16 %v340_v21, %v340_v21 }
  0xb7   :  { %226 = vmatmul.bf16.vlgmr.msra.gmra.mxu1 %v149_v22 }
 0x134   :  { %v227_v24 = vpop.f32.mrf.mxu1 }
 0x135   :  { %v228_v25 = vadd.f32 %v338_v23, %v227_v24 }
 0x137   :  { %v231_v26 = vpack.c.bf16 %v228_v25, %v228_v25 }
 0x139   :  { %232 = vst [vmem:[#allocation8] sm:$0xf] %v231_v26 }
 0x13a   :  { %243 = dma.vmem_to_hbm [thread:$0]  %s239_s12, 64, %s241_s15, [#allocation4]  }
 0x13c   :  { %v229_v27 = vpop.f32.mrf.mxu1 }
 0x13d   :  { %441 = dma.done.wait [#allocation4], 64  }
 0x13e   :  { %442 = vsyncadd [#allocation4], 4294967232 }
 0x13f   :  { %248 = vsyncpa [#allocation3], 1 }
 0x140   :  { %249 = vsyncpa [#allocation6], 1 }
 0x141   :  { %250 = vsyncpa [#allocation4], 1 }

</bundles_post_ra>
